<compile_context>
chip_gen: v7x
topology: tpu7x:2x2x1
jax: 0.10.0
libtpu: 0.0.40
codegen_flags: <defaults>
</compile_context>

<pallas_src>
import numpy as np
import jax
import jax.numpy as jnp
from jax.experimental import pallas as pl
from jax.experimental.pallas import tpu as pltpu

EPS = 1e-5
LEAK = 0.01


def _make_encoder_kernel(B, T, c_in, c_h, c_out):
    BT = B * T

    def kernel(x_ref, w1_ref, b1_ref, wa_ref, ba_ref, gamma_ref, beta_ref,
               wb_ref, bb_ref, wout_ref, bout_ref,
               y_ref, mns_ref, sds_ref, ys_ref):
        i = pl.program_id(0)
        nb = pl.num_programs(0)

        # time index of every flattened row + reflect-boundary masks
        # (hoisted once; reused by both convs of the block).
        t_idx = jax.lax.broadcasted_iota(jnp.int32, (BT, 1), 0) % T
        is_first = t_idx == 0
        is_last = t_idx == (T - 1)

        def conv3(h, w_fused_ref, b_ref):
            # h: (BT, C). Fused k=3 reflect conv: one K=3*C MXU matmul.
            prev_wrap = pltpu.roll(h, shift=1, axis=0)        # row r <- h[r-1]
            next_wrap = pltpu.roll(h, shift=BT - 1, axis=0)   # row r <- h[r+1]
            hm1 = jnp.where(is_first, next_wrap, prev_wrap)   # reflect at t==0
            hp1 = jnp.where(is_last, prev_wrap, next_wrap)    # reflect at t==T-1
            hcat = jnp.concatenate([hm1, h, hp1], axis=1)     # (BT, 3C)
            return (jnp.dot(hcat, w_fused_ref[...],
                            preferred_element_type=jnp.float32)
                    + b_ref[...])

        # ---- conv1d_first (1x1 conv), first grid step only ----
        @pl.when(i == 0)
        def _():
            ys_ref[...] = (jnp.dot(x_ref[...], w1_ref[...],
                                   preferred_element_type=jnp.float32)
                           + b1_ref[...])

        ys = ys_ref[...]                                      # (BT, c_h)

        # ---- ConvNorm1d(k=3) -> BatchNorm1d (train) -> LeakyReLU ----
        h1 = conv3(ys, wa_ref, ba_ref)
        inv_n = 1.0 / float(BT)
        mean = jnp.sum(h1, axis=0, keepdims=True) * inv_n                 # (1, c_h)
        ex2 = jnp.sum(h1 * h1, axis=0, keepdims=True) * inv_n
        var = jnp.maximum(ex2 - mean * mean, 0.0)                         # biased
        scale = jax.lax.rsqrt(var + EPS) * gamma_ref[...]
        shift = beta_ref[...] - mean * scale
        h1 = h1 * scale + shift
        h1 = jnp.where(h1 > 0, h1, LEAK * h1)                             # LeakyReLU

        # ---- ConvNorm1d(k=3) + block residual ----
        h2 = ys + conv3(h1, wb_ref, bb_ref)                               # (BT, c_h)

        # ---- InstanceNorm (per (b,c) over t, UNBIASED var) + y = y + hn ----
        h2b = h2.reshape(B, T, c_h)
        inv_t = 1.0 / float(T)
        mn = jnp.sum(h2b, axis=1, keepdims=True) * inv_t                  # (B,1,c_h)
        ex2b = jnp.sum(h2b * h2b, axis=1, keepdims=True) * inv_t
        var_b = jnp.maximum(ex2b - mn * mn, 0.0) * (float(T) / float(T - 1))
        v = var_b + EPS
        inv_sd = jax.lax.rsqrt(v)
        sd = v * inv_sd                                                   # = sqrt(v)
        mns_ref[...] = mn[:, 0, :]                                        # (B, c_h)
        sds_ref[...] = sd[:, 0, :]

        ys_new = ys + ((h2b - mn) * inv_sd).reshape(BT, c_h)
        ys_ref[...] = ys_new

        # ---- out_layer (1x1 conv), last grid step only; lane-dense (c_out,T) ----
        @pl.when(i == nb - 1)
        def _():
            z = (jnp.dot(wout_ref[...], ys_new.T,
                         preferred_element_type=jnp.float32)
                 + bout_ref[...])                                         # (c_out, BT)
            for b in range(B):
                y_ref[b] = z[:, b * T:(b + 1) * T]

    return kernel


def encoder_forward(x_nct, params):
    """x_nct: (B, c_in, T) float32 (PyTorch NCT layout)."""
    B, c_in, T = x_nct.shape
    nb = params["wa"].shape[0]
    c_h = params["w1"].shape[1]
    c_out = params["wout"].shape[0]
    BT = B * T

    # channels-last, (batch*time) flattened slab; channels sit on the lane axis.
    x_flat = jnp.transpose(x_nct, (0, 2, 1)).reshape(BT, c_in)

    kernel = _make_encoder_kernel(B, T, c_in, c_h, c_out)

    grid_spec = pltpu.PrefetchScalarGridSpec(
        num_scalar_prefetch=0,
        grid=(nb,),
        in_specs=[
            pl.BlockSpec((BT, c_in), lambda i: (0, 0)),                 # x
            pl.BlockSpec((c_in, c_h), lambda i: (0, 0)),                # w1
            pl.BlockSpec((1, c_h), lambda i: (0, 0)),                   # b1
            pl.BlockSpec((None, 3 * c_h, c_h), lambda i: (i, 0, 0)),    # wa
            pl.BlockSpec((None, 1, c_h), lambda i: (i, 0, 0)),          # ba
            pl.BlockSpec((None, 1, c_h), lambda i: (i, 0, 0)),          # gamma
            pl.BlockSpec((None, 1, c_h), lambda i: (i, 0, 0)),          # beta
            pl.BlockSpec((None, 3 * c_h, c_h), lambda i: (i, 0, 0)),    # wb
            pl.BlockSpec((None, 1, c_h), lambda i: (i, 0, 0)),          # bb
            pl.BlockSpec((c_out, c_h), lambda i: (0, 0)),               # wout (c_out, c_h)
            pl.BlockSpec((c_out, 1), lambda i: (0, 0)),                 # bout
        ],
        out_specs=(
            pl.BlockSpec((B, c_out, T), lambda i: (0, 0, 0)),           # y (lane-dense)
            pl.BlockSpec((None, B, c_h), lambda i: (i, 0, 0)),          # mns
            pl.BlockSpec((None, B, c_h), lambda i: (i, 0, 0)),          # sds
        ),
        scratch_shapes=[pltpu.VMEM((BT, c_h), jnp.float32)],            # running y
    )

    y, mns, sds = pl.pallas_call(
        kernel,
        out_shape=(
            jax.ShapeDtypeStruct((B, c_out, T), jnp.float32),
            jax.ShapeDtypeStruct((nb, B, c_h), jnp.float32),
            jax.ShapeDtypeStruct((nb, B, c_h), jnp.float32),
        ),
        grid_spec=grid_spec,
        compiler_params=pltpu.CompilerParams(
            dimension_semantics=("arbitrary",),     # blocks are a serial carry
            vmem_limit_bytes=32 * 1024 * 1024,      # explicit budget (v7x-safe)
        ),
    )(x_flat, params["w1"], params["b1"], params["wa"], params["ba"],
      params["gamma"], params["beta"], params["wb"], params["bb"],
      params["wout"], params["bout"])

    mns_list = [mns[i][:, :, None] for i in range(nb)]   # (B, c_h, 1) per block
    sds_list = [sds[i][:, :, None] for i in range(nb)]
    return y, mns_list, sds_list


# ----------------- plain-JAX reference (for self-check) -----------------
def ref_forward(x_nct, params):
    def conv1x1(x, w_ic_oc, b_row):
        return jnp.einsum("bct,cd->bdt", x, w_ic_oc) + b_row.reshape(1, -1, 1)

    def conv3(x, w_fused, b_row):
        cin = x.shape[1]
        w3 = w_fused.reshape(3, cin, -1)               # (K, c_in, c_out)
        wt = jnp.transpose(w3, (2, 1, 0))              # (c_out, c_in, K) torch layout
        xp = jnp.pad(x, ((0, 0), (0, 0), (1, 1)), mode="reflect")
        out = jax.lax.conv_general_dilated(
            xp, wt, window_strides=(1,), padding="VALID",
            dimension_numbers=("NCH", "OIH", "NCH"))
        return out + b_row.reshape(1, -1, 1)

    y = conv1x1(x_nct, params["w1"], params["b1"])
    mns, sds = [], []
    nb = params["wa"].shape[0]
    for i in range(nb):
        h = conv3(y, params["wa"][i], params["ba"][i])
        mu = jnp.mean(h, axis=(0, 2), keepdims=True)
        var = jnp.mean((h - mu) ** 2, axis=(0, 2), keepdims=True)
        h = ((h - mu) / jnp.sqrt(var + EPS)
             * params["gamma"][i].reshape(1, -1, 1)
             + params["beta"][i].reshape(1, -1, 1))
        h = jnp.where(h > 0, h, LEAK * h)
        h = y + conv3(h, params["wb"][i], params["bb"][i])
        mn = jnp.mean(h, axis=2, keepdims=True)
        sd = jnp.sqrt(jnp.var(h, axis=2, ddof=1, keepdims=True) + EPS)
        mns.append(mn)
        sds.append(sd)
        y = y + (h - mn) / sd
    y = (jnp.einsum("bct,dc->bdt", y, params["wout"])
         + params["bout"].reshape(1, -1, 1))
    return y, mns, sds


def init_params(key, c_in, c_h, c_out, nb):
    ks = jax.random.split(key, 8)

    def xavier(k, shape, fan_in, fan_out):
        bound = (6.0 / (fan_in + fan_out)) ** 0.5
        return jax.random.uniform(k, shape, jnp.float32, -bound, bound)

    def bias(k, shape, fan_in):
        b = 1.0 / (fan_in ** 0.5)
        return jax.random.uniform(k, shape, jnp.float32, -b, b)

    return dict(
        # 1x1 first conv: torch weight (c_h, c_in, 1) stored as (c_in, c_h)
        w1=xavier(ks[0], (c_in, c_h), c_in, c_h),
        b1=bias(ks[1], (1, c_h), c_in),
        # k=3 convs: stored fused as (nb, 3*c_h, c_h), rows = [k0; k1; k2]
        wa=xavier(ks[2], (nb, 3 * c_h, c_h), 3 * c_h, 3 * c_h),
        ba=bias(ks[3], (nb, 1, c_h), 3 * c_h),
        gamma=jnp.ones((nb, 1, c_h), jnp.float32),
        beta=jnp.zeros((nb, 1, c_h), jnp.float32),
        wb=xavier(ks[4], (nb, 3 * c_h, c_h), 3 * c_h, 3 * c_h),
        bb=bias(ks[5], (nb, 1, c_h), 3 * c_h),
        # 1x1 out conv: stored transposed (c_out, c_h) for lane-dense output
        wout=xavier(ks[6], (c_out, c_h), c_h, c_out),
        bout=bias(ks[7], (c_out, 1), c_h),
    )


if __name__ == "__main__":
    B, c_in, c_out, c_h, T = 2, 4, 4, 32, 16
    n_conv_blocks = 2                      # subsample = (1, 1)

    root = jax.random.PRNGKey(0)
    kx, kp = jax.random.split(root)
    x = jax.random.normal(kx, (B, c_in, T), dtype=jnp.float32)
    params = init_params(kp, c_in, c_h, c_out, n_conv_blocks)

    y, mns, sds = encoder_forward(x, params)
    y = jax.block_until_ready(y)
    mns = [jax.block_until_ready(m) for m in mns]
    sds = [jax.block_until_ready(s) for s in sds]

    # self-check against a plain-JAX reference
    y_r, mns_r, sds_r = ref_forward(x, params)
    assert y.shape == (B, c_out, T)
    np.testing.assert_allclose(np.asarray(y), np.asarray(y_r), rtol=1e-4, atol=2e-4)
    for i in range(n_conv_blocks):
        assert mns[i].shape == (B, c_h, 1) and sds[i].shape == (B, c_h, 1)
        np.testing.assert_allclose(np.asarray(mns[i]), np.asarray(mns_r[i]),
                                   rtol=1e-4, atol=2e-4)
        np.testing.assert_allclose(np.asarray(sds[i]), np.asarray(sds_r[i]),
                                   rtol=1e-4, atol=2e-4)

    print("KERNEL_OK")
</pallas_src>

<mosaic_0001>
module attributes {stable_mosaic.version = 11 : i64} {
  func.func @kernel(%arg0: i32, %arg1: memref<32x4xf32, #tpu.memory_space<vmem>>, %arg2: memref<4x32xf32, #tpu.memory_space<vmem>>, %arg3: memref<1x32xf32, #tpu.memory_space<vmem>>, %arg4: memref<1x96x32xf32, #tpu.memory_space<vmem>>, %arg5: memref<1x1x32xf32, #tpu.memory_space<vmem>>, %arg6: memref<1x1x32xf32, #tpu.memory_space<vmem>>, %arg7: memref<1x1x32xf32, #tpu.memory_space<vmem>>, %arg8: memref<1x96x32xf32, #tpu.memory_space<vmem>>, %arg9: memref<1x1x32xf32, #tpu.memory_space<vmem>>, %arg10: memref<4x32xf32, #tpu.memory_space<vmem>>, %arg11: memref<4x1xf32, #tpu.memory_space<vmem>>, %arg12: memref<2x4x16xf32, #tpu.memory_space<vmem>>, %arg13: memref<1x2x32xf32, #tpu.memory_space<vmem>>, %arg14: memref<1x2x32xf32, #tpu.memory_space<vmem>>, %arg15: memref<32x32xf32, #tpu.memory_space<vmem>>) attributes {dimension_semantics = [#tpu.dimension_semantics<arbitrary>], iteration_bounds = array<i64: 2>, scalar_prefetch = 0 : i64, scratch_operands = 1 : i64, tpu.core_type = #tpu.core_type<tc>, window_params = [{pipeline_mode = #tpu.pipeline_mode<synchronous>, transform_indices = @transform_0, window_bounds = array<i64: 32, 4>}, {pipeline_mode = #tpu.pipeline_mode<synchronous>, transform_indices = @transform_1, window_bounds = array<i64: 4, 32>}, {pipeline_mode = #tpu.pipeline_mode<synchronous>, transform_indices = @transform_2, window_bounds = array<i64: 1, 32>}, {transform_indices = @transform_3, window_bounds = array<i64: 1, 96, 32>}, {transform_indices = @transform_4, window_bounds = array<i64: 1, 1, 32>}, {transform_indices = @transform_5, window_bounds = array<i64: 1, 1, 32>}, {transform_indices = @transform_6, window_bounds = array<i64: 1, 1, 32>}, {transform_indices = @transform_7, window_bounds = array<i64: 1, 96, 32>}, {transform_indices = @transform_8, window_bounds = array<i64: 1, 1, 32>}, {pipeline_mode = #tpu.pipeline_mode<synchronous>, transform_indices = @transform_9, window_bounds = array<i64: 4, 32>}, {pipeline_mode = #tpu.pipeline_mode<synchronous>, transform_indices = @transform_10, window_bounds = array<i64: 4, 1>}, {pipeline_mode = #tpu.pipeline_mode<synchronous>, transform_indices = @transform_11, window_bounds = array<i64: 2, 4, 16>}, {transform_indices = @transform_12, window_bounds = array<i64: 1, 2, 32>}, {transform_indices = @transform_13, window_bounds = array<i64: 1, 2, 32>}]} {
    %0 = tpu.iota {dimensions = array<i32: 0>} : vector<32x1xi32>
    %c16_i32 = arith.constant 16 : i32
    %c0_i32 = arith.constant 0 : i32
    %1 = arith.cmpi eq, %c16_i32, %c0_i32 : i32
    %c1_i32 = arith.constant 1 : i32
    %2 = arith.select %1, %c1_i32, %c16_i32 : i32
    %3 = vector.broadcast %2 : i32 to vector<32x1xi32>
    %4 = arith.remsi %0, %3 : vector<32x1xi32>
    %c0_i32_0 = arith.constant 0 : i32
    %5 = vector.broadcast %c0_i32_0 : i32 to vector<32x1xi32>
    %6 = arith.cmpi ne, %4, %5 : vector<32x1xi32>
    %c0_i32_1 = arith.constant 0 : i32
    %7 = vector.broadcast %c0_i32_1 : i32 to vector<32x1xi32>
    %8 = arith.cmpi slt, %4, %7 : vector<32x1xi32>
    %c0_i32_2 = arith.constant 0 : i32
    %9 = arith.cmpi slt, %2, %c0_i32_2 : i32
    %10 = vector.broadcast %9 : i1 to vector<32x1xi1>
    %11 = vector.broadcast %10 : vector<32x1xi1> to vector<32x1xi1>
    %12 = arith.xori %8, %11 : vector<32x1xi1>
    %13 = arith.andi %12, %6 : vector<32x1xi1>
    %14 = vector.broadcast %2 : i32 to vector<32x1xi32>
    %15 = arith.addi %4, %14 : vector<32x1xi32>
    %16 = arith.select %13, %15, %4 : vector<32x1xi1>, vector<32x1xi32>
    %c0_i32_3 = arith.constant 0 : i32
    %17 = vector.broadcast %c0_i32_3 : i32 to vector<32x1xi32>
    %18 = arith.cmpi eq, %16, %17 : vector<32x1xi32>
    %c15_i32 = arith.constant 15 : i32
    %19 = vector.broadcast %c15_i32 : i32 to vector<32x1xi32>
    %20 = arith.cmpi eq, %16, %19 : vector<32x1xi32>
    %c0_i32_4 = arith.constant 0 : i32
    %21 = arith.cmpi eq, %arg0, %c0_i32_4 : i32
    %22 = arith.extui %21 : i1 to i32
    %c0_i32_5 = arith.constant 0 : i32
    %23 = arith.cmpi ne, %22, %c0_i32_5 : i32
    scf.if %23 {
      %c0_54 = arith.constant 0 : index
      %c0_55 = arith.constant 0 : index
      %128 = vector.load %arg1[%c0_54, %c0_55] : memref<32x4xf32, #tpu.memory_space<vmem>>, vector<32x4xf32>
      %c0_56 = arith.constant 0 : index
      %c0_57 = arith.constant 0 : index
      %129 = vector.load %arg2[%c0_56, %c0_57] : memref<4x32xf32, #tpu.memory_space<vmem>>, vector<4x32xf32>
      %cst_58 = arith.constant dense<0.000000e+00> : vector<32x32xf32>
      %130 = tpu.matmul %128, %129, %cst_58 {dimension_numbers = #tpu.dot_dimension_numbers<[1], [0], [0], [1], [0, 0, 1, 1], [], []>} : vector<32x4xf32>, vector<4x32xf32>, vector<32x32xf32> -> vector<32x32xf32>
      %c0_59 = arith.constant 0 : index
      %c0_60 = arith.constant 0 : index
      %131 = vector.load %arg3[%c0_59, %c0_60] : memref<1x32xf32, #tpu.memory_space<vmem>>, vector<1x32xf32>
      %132 = vector.broadcast %131 : vector<1x32xf32> to vector<32x32xf32>
      %133 = arith.addf %130, %132 : vector<32x32xf32>
      %c0_61 = arith.constant 0 : index
      %c0_62 = arith.constant 0 : index
      %134 = vector.load %arg15[%c0_61, %c0_62] : memref<32x32xf32, #tpu.memory_space<vmem>>, vector<32x32xf32>
      tpu.vector_store %arg15[%c0_61, %c0_62], %133 {strides = array<i32>} : memref<32x32xf32, #tpu.memory_space<vmem>>, vector<32x32xf32>,
    } else {
    }
    %c0 = arith.constant 0 : index
    %c0_6 = arith.constant 0 : index
    %24 = vector.load %arg15[%c0, %c0_6] : memref<32x32xf32, #tpu.memory_space<vmem>>, vector<32x32xf32>
    %c1_i32_7 = arith.constant 1 : i32
    %25 = tpu.dynamic_rotate %24 by %c1_i32_7 dim 0 : vector<32x32xf32>, i32 -> vector<32x32xf32>
    %c31_i32 = arith.constant 31 : i32
    %26 = tpu.dynamic_rotate %24 by %c31_i32 dim 0 : vector<32x32xf32>, i32 -> vector<32x32xf32>
    %27 = vector.shape_cast %18 : vector<32x1xi1> to vector<32x1xi1>
    %28 = vector.broadcast %27 : vector<32x1xi1> to vector<32x32xi1>
    %29 = arith.select %28, %26, %25 : vector<32x32xi1>, vector<32x32xf32>
    %30 = vector.shape_cast %20 : vector<32x1xi1> to vector<32x1xi1>
    %31 = vector.broadcast %30 : vector<32x1xi1> to vector<32x32xi1>
    %32 = arith.select %31, %25, %26 : vector<32x32xi1>, vector<32x32xf32>
    %33 = tpu.concatenate %29, %24, %32 in 1 : vector<32x32xf32>, vector<32x32xf32>, vector<32x32xf32> -> vector<32x96xf32>
    %c0_8 = arith.constant 0 : index
    %c0_9 = arith.constant 0 : index
    %c0_10 = arith.constant 0 : index
    %34 = vector.load %arg4[%c0_8, %c0_9, %c0_10] : memref<1x96x32xf32, #tpu.memory_space<vmem>>, vector<1x96x32xf32>
    %35 = vector.shape_cast %34 : vector<1x96x32xf32> to vector<96x32xf32>
    %cst = arith.constant dense<0.000000e+00> : vector<32x32xf32>
    %36 = tpu.matmul %33, %35, %cst {dimension_numbers = #tpu.dot_dimension_numbers<[1], [0], [0], [1], [0, 0, 1, 1], [], []>} : vector<32x96xf32>, vector<96x32xf32>, vector<32x32xf32> -> vector<32x32xf32>
    %c0_11 = arith.constant 0 : index
    %c0_12 = arith.constant 0 : index
    %c0_13 = arith.constant 0 : index
    %37 = vector.load %arg5[%c0_11, %c0_12, %c0_13] : memref<1x1x32xf32, #tpu.memory_space<vmem>>, vector<1x1x32xf32>
    %38 = vector.shape_cast %37 : vector<1x1x32xf32> to vector<1x32xf32>
    %39 = vector.broadcast %38 : vector<1x32xf32> to vector<32x32xf32>
    %40 = arith.addf %36, %39 : vector<32x32xf32>
    %cst_14 = arith.constant dense<0.000000e+00> : vector<32xf32>
    %41 = vector.multi_reduction <add>, %40, %cst_14 [0] : vector<32x32xf32> to vector<32xf32>
    %42 = vector.shape_cast %41 : vector<32xf32> to vector<1x32xf32>
    %cst_15 = arith.constant 3.125000e-02 : f32
    %43 = vector.broadcast %cst_15 : f32 to vector<1x32xf32>
    %44 = arith.mulf %42, %43 : vector<1x32xf32>
    %45 = arith.mulf %40, %40 : vector<32x32xf32>
    %cst_16 = arith.constant dense<0.000000e+00> : vector<32xf32>
    %46 = vector.multi_reduction <add>, %45, %cst_16 [0] : vector<32x32xf32> to vector<32xf32>
    %47 = vector.shape_cast %46 : vector<32xf32> to vector<1x32xf32>
    %cst_17 = arith.constant 3.125000e-02 : f32
    %48 = vector.broadcast %cst_17 : f32 to vector<1x32xf32>
    %49 = arith.mulf %47, %48 : vector<1x32xf32>
    %50 = arith.mulf %44, %44 : vector<1x32xf32>
    %51 = arith.subf %49, %50 : vector<1x32xf32>
    %cst_18 = arith.constant 0.000000e+00 : f32
    %52 = vector.broadcast %cst_18 : f32 to vector<1x32xf32>
    %53 = arith.maximumf %51, %52 : vector<1x32xf32>
    %cst_19 = arith.constant 9.99999974E-6 : f32
    %54 = vector.broadcast %cst_19 : f32 to vector<1x32xf32>
    %55 = arith.addf %53, %54 : vector<1x32xf32>
    %56 = math.rsqrt %55 : vector<1x32xf32>
    %c0_20 = arith.constant 0 : index
    %c0_21 = arith.constant 0 : index
    %c0_22 = arith.constant 0 : index
    %57 = vector.load %arg6[%c0_20, %c0_21, %c0_22] : memref<1x1x32xf32, #tpu.memory_space<vmem>>, vector<1x1x32xf32>
    %58 = vector.shape_cast %57 : vector<1x1x32xf32> to vector<1x32xf32>
    %59 = arith.mulf %56, %58 : vector<1x32xf32>
    %c0_23 = arith.constant 0 : index
    %c0_24 = arith.constant 0 : index
    %c0_25 = arith.constant 0 : index
    %60 = vector.load %arg7[%c0_23, %c0_24, %c0_25] : memref<1x1x32xf32, #tpu.memory_space<vmem>>, vector<1x1x32xf32>
    %61 = vector.shape_cast %60 : vector<1x1x32xf32> to vector<1x32xf32>
    %62 = arith.mulf %44, %59 : vector<1x32xf32>
    %63 = arith.subf %61, %62 : vector<1x32xf32>
    %64 = vector.broadcast %59 : vector<1x32xf32> to vector<32x32xf32>
    %65 = arith.mulf %40, %64 : vector<32x32xf32>
    %66 = vector.broadcast %63 : vector<1x32xf32> to vector<32x32xf32>
    %67 = arith.addf %65, %66 : vector<32x32xf32>
    %cst_26 = arith.constant 0.000000e+00 : f32
    %68 = vector.broadcast %cst_26 : f32 to vector<32x32xf32>
    %69 = arith.cmpf ogt, %67, %68 : vector<32x32xf32>
    %cst_27 = arith.constant 0.00999999977 : f32
    %70 = vector.broadcast %cst_27 : f32 to vector<32x32xf32>
    %71 = arith.mulf %70, %67 : vector<32x32xf32>
    %72 = arith.select %69, %67, %71 : vector<32x32xi1>, vector<32x32xf32>
    %c1_i32_28 = arith.constant 1 : i32
    %73 = tpu.dynamic_rotate %72 by %c1_i32_28 dim 0 : vector<32x32xf32>, i32 -> vector<32x32xf32>
    %c31_i32_29 = arith.constant 31 : i32
    %74 = tpu.dynamic_rotate %72 by %c31_i32_29 dim 0 : vector<32x32xf32>, i32 -> vector<32x32xf32>
    %75 = vector.shape_cast %18 : vector<32x1xi1> to vector<32x1xi1>
    %76 = vector.broadcast %75 : vector<32x1xi1> to vector<32x32xi1>
    %77 = arith.select %76, %74, %73 : vector<32x32xi1>, vector<32x32xf32>
    %78 = vector.shape_cast %20 : vector<32x1xi1> to vector<32x1xi1>
    %79 = vector.broadcast %78 : vector<32x1xi1> to vector<32x32xi1>
    %80 = arith.select %79, %73, %74 : vector<32x32xi1>, vector<32x32xf32>
    %81 = tpu.concatenate %77, %72, %80 in 1 : vector<32x32xf32>, vector<32x32xf32>, vector<32x32xf32> -> vector<32x96xf32>
    %c0_30 = arith.constant 0 : index
    %c0_31 = arith.constant 0 : index
    %c0_32 = arith.constant 0 : index
    %82 = vector.load %arg8[%c0_30, %c0_31, %c0_32] : memref<1x96x32xf32, #tpu.memory_space<vmem>>, vector<1x96x32xf32>
    %83 = vector.shape_cast %82 : vector<1x96x32xf32> to vector<96x32xf32>
    %cst_33 = arith.constant dense<0.000000e+00> : vector<32x32xf32>
    %84 = tpu.matmul %81, %83, %cst_33 {dimension_numbers = #tpu.dot_dimension_numbers<[1], [0], [0], [1], [0, 0, 1, 1], [], []>} : vector<32x96xf32>, vector<96x32xf32>, vector<32x32xf32> -> vector<32x32xf32>
    %c0_34 = arith.constant 0 : index
    %c0_35 = arith.constant 0 : index
    %c0_36 = arith.constant 0 : index
    %85 = vector.load %arg9[%c0_34, %c0_35, %c0_36] : memref<1x1x32xf32, #tpu.memory_space<vmem>>, vector<1x1x32xf32>
    %86 = vector.shape_cast %85 : vector<1x1x32xf32> to vector<1x32xf32>
    %87 = vector.broadcast %86 : vector<1x32xf32> to vector<32x32xf32>
    %88 = arith.addf %84, %87 : vector<32x32xf32>
    %89 = arith.addf %24, %88 : vector<32x32xf32>
    %90 = vector.shape_cast %89 : vector<32x32xf32> to vector<2x16x32xf32>
    %cst_37 = arith.constant dense<0.000000e+00> : vector<2x32xf32>
    %91 = vector.multi_reduction <add>, %90, %cst_37 [1] : vector<2x16x32xf32> to vector<2x32xf32>
    %92 = vector.shape_cast %91 : vector<2x32xf32> to vector<2x1x32xf32>
    %cst_38 = arith.constant 6.250000e-02 : f32
    %93 = vector.broadcast %cst_38 : f32 to vector<2x1x32xf32>
    %94 = arith.mulf %92, %93 : vector<2x1x32xf32>
    %95 = arith.mulf %90, %90 : vector<2x16x32xf32>
    %cst_39 = arith.constant dense<0.000000e+00> : vector<2x32xf32>
    %96 = vector.multi_reduction <add>, %95, %cst_39 [1] : vector<2x16x32xf32> to vector<2x32xf32>
    %97 = vector.shape_cast %96 : vector<2x32xf32> to vector<2x1x32xf32>
    %cst_40 = arith.constant 6.250000e-02 : f32
    %98 = vector.broadcast %cst_40 : f32 to vector<2x1x32xf32>
    %99 = arith.mulf %97, %98 : vector<2x1x32xf32>
    %100 = arith.mulf %94, %94 : vector<2x1x32xf32>
    %101 = arith.subf %99, %100 : vector<2x1x32xf32>
    %cst_41 = arith.constant 0.000000e+00 : f32
    %102 = vector.broadcast %cst_41 : f32 to vector<2x1x32xf32>
    %103 = arith.maximumf %101, %102 : vector<2x1x32xf32>
    %cst_42 = arith.constant 1.06666672 : f32
    %104 = vector.broadcast %cst_42 : f32 to vector<2x1x32xf32>
    %105 = arith.mulf %103, %104 : vector<2x1x32xf32>
    %cst_43 = arith.constant 9.99999974E-6 : f32
    %106 = vector.broadcast %cst_43 : f32 to vector<2x1x32xf32>
    %107 = arith.addf %105, %106 : vector<2x1x32xf32>
    %108 = math.rsqrt %107 : vector<2x1x32xf32>
    %109 = arith.mulf %107, %108 : vector<2x1x32xf32>
    %110 = vector.shape_cast %94 : vector<2x1x32xf32> to vector<2x32xf32>
    %c0_44 = arith.constant 0 : index
    %c0_45 = arith.constant 0 : index
    %c0_46 = arith.constant 0 : index
    %111 = vector.load %arg13[%c0_44, %c0_45, %c0_46] : memref<1x2x32xf32, #tpu.memory_space<vmem>>, vector<1x2x32xf32>
    %112 = vector.shape_cast %111 : vector<1x2x32xf32> to vector<2x32xf32>
    %113 = vector.shape_cast %110 : vector<2x32xf32> to vector<1x2x32xf32>
    tpu.vector_store %arg13[%c0_44, %c0_45, %c0_46], %113 {strides = array<i32>} : memref<1x2x32xf32, #tpu.memory_space<vmem>>, vector<1x2x32xf32>,
    %114 = vector.shape_cast %109 : vector<2x1x32xf32> to vector<2x32xf32>
    %c0_47 = arith.constant 0 : index
    %c0_48 = arith.constant 0 : index
    %c0_49 = arith.constant 0 : index
    %115 = vector.load %arg14[%c0_47, %c0_48, %c0_49] : memref<1x2x32xf32, #tpu.memory_space<vmem>>, vector<1x2x32xf32>
    %116 = vector.shape_cast %115 : vector<1x2x32xf32> to vector<2x32xf32>
    %117 = vector.shape_cast %114 : vector<2x32xf32> to vector<1x2x32xf32>
    tpu.vector_store %arg14[%c0_47, %c0_48, %c0_49], %117 {strides = array<i32>} : memref<1x2x32xf32, #tpu.memory_space<vmem>>, vector<1x2x32xf32>,
    %118 = vector.broadcast %94 : vector<2x1x32xf32> to vector<2x16x32xf32>
    %119 = arith.subf %90, %118 : vector<2x16x32xf32>
    %120 = vector.broadcast %108 : vector<2x1x32xf32> to vector<2x16x32xf32>
    %121 = arith.mulf %119, %120 : vector<2x16x32xf32>
    %122 = vector.shape_cast %121 : vector<2x16x32xf32> to vector<32x32xf32>
    %123 = arith.addf %24, %122 : vector<32x32xf32>
    %c0_50 = arith.constant 0 : index
    %c0_51 = arith.constant 0 : index
    %124 = vector.load %arg15[%c0_50, %c0_51] : memref<32x32xf32, #tpu.memory_space<vmem>>, vector<32x32xf32>
    tpu.vector_store %arg15[%c0_50, %c0_51], %123 {strides = array<i32>} : memref<32x32xf32, #tpu.memory_space<vmem>>, vector<32x32xf32>,
    %c1_i32_52 = arith.constant 1 : i32
    %125 = arith.cmpi eq, %arg0, %c1_i32_52 : i32
    %126 = arith.extui %125 : i1 to i32
    %c0_i32_53 = arith.constant 0 : i32
    %127 = arith.cmpi ne, %126, %c0_i32_53 : i32
    scf.if %127 {
      %c0_54 = arith.constant 0 : index
      %c0_55 = arith.constant 0 : index
      %128 = vector.load %arg10[%c0_54, %c0_55] : memref<4x32xf32, #tpu.memory_space<vmem>>, vector<4x32xf32>
      %129 = tpu.transpose %123, [1, 0] : vector<32x32xf32> -> vector<32x32xf32>
      %cst_56 = arith.constant dense<0.000000e+00> : vector<4x32xf32>
      %130 = tpu.matmul %128, %129, %cst_56 {dimension_numbers = #tpu.dot_dimension_numbers<[1], [0], [0], [1], [0, 0, 1, 1], [], []>} : vector<4x32xf32>, vector<32x32xf32>, vector<4x32xf32> -> vector<4x32xf32>
      %c0_57 = arith.constant 0 : index
      %c0_58 = arith.constant 0 : index
      %131 = vector.load %arg11[%c0_57, %c0_58] : memref<4x1xf32, #tpu.memory_space<vmem>>, vector<4x1xf32>
      %132 = vector.broadcast %131 : vector<4x1xf32> to vector<4x32xf32>
      %133 = arith.addf %130, %132 : vector<4x32xf32>
      %134 = vector.extract_strided_slice %133 {offsets = [0, 0], sizes = [4, 16], strides = [1, 1]} : vector<4x32xf32> to vector<4x16xf32>
      %c0_59 = arith.constant 0 : index
      %c0_60 = arith.constant 0 : index
      %c0_61 = arith.constant 0 : index
      %135 = vector.load %arg12[%c0_59, %c0_60, %c0_61] : memref<2x4x16xf32, #tpu.memory_space<vmem>>, vector<1x4x16xf32>
      %136 = vector.shape_cast %135 : vector<1x4x16xf32> to vector<4x16xf32>
      %137 = vector.shape_cast %134 : vector<4x16xf32> to vector<1x4x16xf32>
      tpu.vector_store %arg12[%c0_59, %c0_60, %c0_61], %137 {strides = array<i32>} : memref<2x4x16xf32, #tpu.memory_space<vmem>>, vector<1x4x16xf32>,
      %138 = vector.extract_strided_slice %133 {offsets = [0, 16], sizes = [4, 16], strides = [1, 1]} : vector<4x32xf32> to vector<4x16xf32>
      %c1 = arith.constant 1 : index
      %c0_62 = arith.constant 0 : index
      %c0_63 = arith.constant 0 : index
      %139 = vector.load %arg12[%c1, %c0_62, %c0_63] : memref<2x4x16xf32, #tpu.memory_space<vmem>>, vector<1x4x16xf32>
      %140 = vector.shape_cast %139 : vector<1x4x16xf32> to vector<4x16xf32>
      %141 = vector.shape_cast %138 : vector<4x16xf32> to vector<1x4x16xf32>
      tpu.vector_store %arg12[%c1, %c0_62, %c0_63], %141 {strides = array<i32>} : memref<2x4x16xf32, #tpu.memory_space<vmem>>, vector<1x4x16xf32>,
    } else {
    }
    return
  }
  func.func @transform_0(%arg0: i32) -> (i32, i32) {
    %c0_i32 = arith.constant 0 : i32
    %c0_i32_0 = arith.constant 0 : i32
    %c0_i32_1 = arith.constant 0 : i32
    return %c0_i32, %c0_i32_0 : i32, i32
  }
  func.func @transform_1(%arg0: i32) -> (i32, i32) {
    %c0_i32 = arith.constant 0 : i32
    %c0_i32_0 = arith.constant 0 : i32
    %c0_i32_1 = arith.constant 0 : i32
    return %c0_i32, %c0_i32_0 : i32, i32
  }
  func.func @transform_2(%arg0: i32) -> (i32, i32) {
    %c0_i32 = arith.constant 0 : i32
    %c0_i32_0 = arith.constant 0 : i32
    %c0_i32_1 = arith.constant 0 : i32
    return %c0_i32, %c0_i32_0 : i32, i32
  }
  func.func @transform_3(%arg0: i32) -> (i32, i32, i32) {
    %c0_i32 = arith.constant 0 : i32
    %c0_i32_0 = arith.constant 0 : i32
    %c0_i32_1 = arith.constant 0 : i32
    return %arg0, %c0_i32, %c0_i32_0 : i32, i32, i32
  }
  func.func @transform_4(%arg0: i32) -> (i32, i32, i32) {
    %c0_i32 = arith.constant 0 : i32
    %c0_i32_0 = arith.constant 0 : i32
    %c0_i32_1 = arith.constant 0 : i32
    return %arg0, %c0_i32, %c0_i32_0 : i32, i32, i32
  }
  func.func @transform_5(%arg0: i32) -> (i32, i32, i32) {
    %c0_i32 = arith.constant 0 : i32
    %c0_i32_0 = arith.constant 0 : i32
    %c0_i32_1 = arith.constant 0 : i32
    return %arg0, %c0_i32, %c0_i32_0 : i32, i32, i32
  }
  func.func @transform_6(%arg0: i32) -> (i32, i32, i32) {
    %c0_i32 = arith.constant 0 : i32
    %c0_i32_0 = arith.constant 0 : i32
    %c0_i32_1 = arith.constant 0 : i32
    return %arg0, %c0_i32, %c0_i32_0 : i32, i32, i32
  }
  func.func @transform_7(%arg0: i32) -> (i32, i32, i32) {
    %c0_i32 = arith.constant 0 : i32
    %c0_i32_0 = arith.constant 0 : i32
    %c0_i32_1 = arith.constant 0 : i32
    return %arg0, %c0_i32, %c0_i32_0 : i32, i32, i32
  }
  func.func @transform_8(%arg0: i32) -> (i32, i32, i32) {
    %c0_i32 = arith.constant 0 : i32
    %c0_i32_0 = arith.constant 0 : i32
    %c0_i32_1 = arith.constant 0 : i32
    return %arg0, %c0_i32, %c0_i32_0 : i32, i32, i32
  }
  func.func @transform_9(%arg0: i32) -> (i32, i32) {
    %c0_i32 = arith.constant 0 : i32
    %c0_i32_0 = arith.constant 0 : i32
    %c0_i32_1 = arith.constant 0 : i32
    return %c0_i32, %c0_i32_0 : i32, i32
  }
  func.func @transform_10(%arg0: i32) -> (i32, i32) {
    %c0_i32 = arith.constant 0 : i32
    %c0_i32_0 = arith.constant 0 : i32
    %c0_i32_1 = arith.constant 0 : i32
    return %c0_i32, %c0_i32_0 : i32, i32
  }
  func.func @transform_11(%arg0: i32) -> (i32, i32, i32) {
    %c0_i32 = arith.constant 0 : i32
    %c0_i32_0 = arith.constant 0 : i32
    %c0_i32_1 = arith.constant 0 : i32
    %c0_i32_2 = arith.constant 0 : i32
    return %c0_i32, %c0_i32_0, %c0_i32_1 : i32, i32, i32
  }
  func.func @transform_12(%arg0: i32) -> (i32, i32, i32) {
    %c0_i32 = arith.constant 0 : i32
    %c0_i32_0 = arith.constant 0 : i32
    %c0_i32_1 = arith.constant 0 : i32
    return %arg0, %c0_i32, %c0_i32_0 : i32, i32, i32
  }
  func.func @transform_13(%arg0: i32) -> (i32, i32, i32) {
    %c0_i32 = arith.constant 0 : i32
    %c0_i32_0 = arith.constant 0 : i32
    %c0_i32_1 = arith.constant 0 : i32
    return %arg0, %c0_i32, %c0_i32_0 : i32, i32, i32
  }
}

</mosaic_0001>

<bundles_post_ra>
// kernel: tpu_custom_call.1
= control target key start
LH: loop header
LB: loop body
LE: loop exit
PB: predicated region body
PF: predicated region fallthrough
CT: control target
= control target key end

     0   :  { %s2498_s0 = inlined_call_operand.vmem [shape: f32[32,4], index: 0, kind: input, shape index: {}]   ;;  %s2499_s1 = inlined_call_operand.vmem [shape: f32[4,32], index: 1, kind: input, shape index: {}]   ;;  %s2500_s2 = inlined_call_operand.vmem [shape: f32[1,32], index: 2, kind: input, shape index: {}]   ;;  %s2501_s3 = inlined_call_operand.vmem [shape: f32[2,96,32], index: 3, kind: input, shape index: {}]   ;;  %s2502_s4 = inlined_call_operand.vmem [shape: f32[2,1,32], index: 4, kind: input, shape index: {}]   ;;  %s2503_s5 = inlined_call_operand.vmem [shape: f32[2,1,32], index: 5, kind: input, shape index: {}]   ;;  %s2504_s6 = inlined_call_operand.vmem [shape: f32[2,1,32], index: 6, kind: input, shape index: {}]   ;;  %s2505_s7 = inlined_call_operand.vmem [shape: f32[2,96,32], index: 7, kind: input, shape index: {}]   ;;  %s2506_s8 = inlined_call_operand.vmem [shape: f32[2,1,32], index: 8, kind: input, shape index: {}]   ;;  %s2507_s9 = inlined_call_operand.vmem [shape: f32[4,32], index: 9, kind: input, shape index: {}]   ;;  %s2508_s10 = inlined_call_operand.vmem [shape: f32[4,1], index: 10, kind: input, shape index: {}]   ;;  %s2509_s11 = inlined_call_operand.hbm [shape: f32[2,4,16], index: 11, kind: output, shape index: {0}]   ;;  %s2510_s12 = inlined_call_operand.hbm [shape: f32[2,2,32], index: 12, kind: output, shape index: {1}]   ;;  %s2511_s13 = inlined_call_operand.hbm [shape: f32[2,2,32], index: 13, kind: output, shape index: {2}]  }
   0x1   :  { %2519 = sst [smem:[#allocation15_spill]] %s2498_s0 }
   0x2   :  { %19 = vsyncpa [#allocation4], 0 }
   0x3   :  { %20 = vsyncpa [#allocation6], 0 }
   0x4   :  { %22 = vsyncpa [#allocation6 + $0x1], 0  ;;  %s2038_s25 = smov 0   ;;  %s2040_s26 = smov 0  }
   0x5   :  { %s2042_s27 = smov 0   ;;  %s2044_s28 = smov 0  }
   0x6 LB: > { %2520 = sst [smem:[#allocation10_spill]] %s1947_s26  ;;  %s2057_s29 = sadd.s32 4294967295, %s1955_s28   ;;  %s1955_s28 = sphi %s2044_s28, %s2547_s28   ;;  %s1951_s27 = sphi %s2042_s27, %s2550_s27   ;;  %s1947_s26 = sphi %s2040_s26, %s2549_s26   ;;  %s1943_s25 = sphi %s2038_s25, %s2548_s25  }
   0x7   : > { %2521 = sst [smem:[#allocation11_spill]] %s1951_s27  ;;  %s2512_s30 = sadd.s32 4294967294, %s1955_s28  }
   0x8   : > { %s2061_s14 = sadd.s32 1, %s1955_s28   ;;  %s317_s15 = sadd.s32 1, %s1951_s27 }
   0x9   : > { %2522 = sst [smem:[#allocation12_spill]] %s2061_s14  ;;  %s314_s16 = ssub.s32 %s1955_s28, %s2061_s14 }
   0xa   : > { %p327_p0 = scmp.ne.s32.totalorder %s1951_s27, %s1947_s26  ;;  %p315_p1 = scmp.eq.s32.totalorder %s314_s16, 0 }
   0xb   : > { %p328_p2 = scmp.eq.s32.totalorder %s2057_s29, 1  ;;  %p333_p3 = scmp.ne.s32.totalorder %s1947_s26, %s1943_s25 }
   0xc   : > { %p334_p4 = scmp.eq.s32.totalorder %s2512_s30, 1  ;;  %p1553_p7 = scmp.ge.s32.totalorder %s1955_s28, 1 }
   0xd   : > { %s2073_s17 = scalar_select %p315_p1, %s1951_s27, %s317_s15  }
   0xe   : > { %p2077_p5 = por %p328_p2, %p327_p0  ;;  %p2081_p6 = por %p334_p4, %p333_p3 }
   0xf   : > { %2523 = sst [smem:[#allocation13_spill]] %s2073_s17  ;;  %p433_p8 = scmp.lt.s32.totalorder %s1955_s28, 3 }
  0x10   : > { %s2525_s19 = scalar_select %p2081_p6, 1, 0 }
  0x11   : > { %p434_p9 = pnand %p1553_p7, %p433_p8 }
  0x12   : > { %2526 = sst [smem:[#allocation14_spill]] %s2525_s19  ;;  %s489_s20 = sand.u32 (!%p434_p9), 1, %s1947_s26   ;;  %v521_v0 = vlaneseq (!%p434_p9) }
  0x13   : > { %437 = sbr.rel (%p434_p9) target bundleno = 1460 (0x5b4), region = 64  ;;  %p499_p10 = scmp.lt.s32.totalorder (!%p434_p9), %s2057_s29, 1 }
  0x14   : > { %s2089_s21 = sshll.u32 (!%p434_p9), %s489_s20, 1  ;;  %v2091_v1 = vshrl.u32 (!%p434_p9), %v521_v0, 7  ;;  %p1558_p11 = scmp.ne.s32.totalorder (!%p434_p9), %s2057_s29, 0 }
  0x16   : > { %v523_v2 = vadd.s32 (!%p434_p9), 8, %v2091_v1  ;;  %v524_v3 = vadd.s32 (!%p434_p9), 16, %v2091_v1  ;;  %v525_v4 = vadd.s32 (!%p434_p9), 24, %v2091_v1  ;;  %v530_v5 = vand.u32 (!%p434_p9), 15, %v2091_v1 }
  0x18   : > { %v537_v6 = vand.u32 (!%p434_p9), 15, %v523_v2  ;;  %v544_v7 = vand.u32 (!%p434_p9), 15, %v524_v3  ;;  %v551_v8 = vand.u32 (!%p434_p9), 15, %v525_v4  ;;  %vm2113_vm0 = vcmp.eq.s32.totalorder (!%p434_p9), %v530_v5, 0 }
  0x1a   : > { %s2094_s22 = scalar_select %p499_p10, %s2057_s29, 1  ;;  %vm2131_vm1 = vcmp.eq.s32.totalorder %v544_v7, 0  ;;  %vm2135_vm2 = vcmp.eq.s32.totalorder %v537_v6, 15  ;;  %vm2139_vm3 = vcmp.eq.s32.totalorder %v551_v8, 15 }
  0x1b   : > { %585 = sbr.rel (%p1558_p11) target bundleno = 251 (0xfb), region = 68  ;;  %v590_v13 = vld [vmem:[%s2499_s1] sm:$0xf] (!%p1558_p11)  ;;  %vm611_vm4 = vcmask (!%p1558_p11), 1043456   ;;  %s2535_s0 = sld [smem:[#allocation15_spill]] (!%p1558_p11)  ;;  %vm598_vm5 = vcmask (!%p1558_p11), 31744  }
  0x1c   : > { %s1768_s23 = smul.u32 96, %s2094_s22  ;;  %1631 = vmatprep.subr.msk.mxu0 (!%p1558_p11), %vm611_vm4, %v590_v13  ;;  %1766 = vmatprep.subr.msk.mxu1 (!%p1558_p11), %vm611_vm4, %v590_v13  ;;  %v1559_v18 = vld [vmem:[%s2500_s2] ss:$0 sm:$0xff] (!%p1558_p11)  ;;  %vm700_vm6 = vcmask (!%p1558_p11), 261120  }
  0x1d   : > { %1632 = vmatpush3.msk.msra.mxu0 (!%p1558_p11), %vm611_vm4, %v590_v13  ;;  %1767 = vmatpush3.msk.msra.mxu1 (!%p1558_p11), %vm611_vm4, %v590_v13 }
  0x1e   : > { %s2120_s24 = scalar_lea.vmem %s2501_s3, %s1768_s23  ;;  %s2125_s16 = scalar_lea.vmem %s2505_s7, %s1768_s23 }
  0x21   : > { %v586_v14 = vld [vmem:[%s2535_s0] sm:$0xff] (!%p1558_p11)  ;;  %v588_v15 = vld [vmem:[%s2535_s0 + $0x10] sm:$0xff] (!%p1558_p11)  ;;  %v587_v16 = vld [vmem:[%s2535_s0 + $0x8] sm:$0xff] (!%p1558_p11) }
  0x22   : > { %v589_v17 = vld [vmem:[%s2535_s0 + $0x18] sm:$0xff]  ;;  %1633 = vmatprep.mubr.msk.f32.mxu0 %vm598_vm5, %v586_v14  ;;  %1636 = vmatprep.mubr.msk.f32.mxu1 %vm598_vm5, %v588_v15 }
  0x23   : > { %1634 = vmatmul.mubr.msk.f32.vlgmr.msra.gmra.mrb[0].mxu0 %vm598_vm5, %v587_v16  ;;  %1637 = vmatmul.mubr.msk.f32.vlgmr.msra.gmra.mrb[0].mxu1 %vm598_vm5, %v589_v17 }
  0xf6   : > { %v1635_v19 = vpop.f32.mrb[0].mxu0  ;;  %v1638_v20 = vpop.f32.mrb[0].mxu1 }
  0xf7   : > { %v687_v21 = vadd.f32 %v1635_v19, %v1559_v18  ;;  %v697_v22 = vadd.f32 %v1638_v20, %v1559_v18  ;;  %v681_v23 = vpop.f32.mrb[1].mxu0  ;;  %v691_v24 = vpop.f32.mrb[1].mxu1 }
  0xf8   : > { %v682_v25 = vadd.f32 %v1559_v18, %v681_v23  ;;  %v692_v26 = vadd.f32 %v1559_v18, %v691_v24 }
  0xf9   : > { %702 = vst.msk [vmem:[#allocation2 + $0x8] sm:$0xff] %vm700_vm6, %v687_v21  ;;  %704 = vst.msk [vmem:[#allocation2 + $0x18] sm:$0xff] %vm700_vm6, %v697_v22 }
  0xfa   : > { %701 = vst.msk [vmem:[#allocation2] sm:$0xff] %vm700_vm6, %v682_v25  ;;  %703 = vst.msk [vmem:[#allocation2 + $0x10] sm:$0xff] %vm700_vm6, %v692_v26 }
  0xfb PF: > { %vm713_vm7 = vcmp.lt.s32.totalorder %v2091_v1, 1  ;;  %vm722_vm8 = vcmp.lt.s32.totalorder %v2091_v1, 7  ;;  %s1957_s26 = smov 32   ;;  %v793_v39 = vld [vmem:[%s2120_s24] sm:$0xff]  ;;  %v794_v40 = vld [vmem:[%s2120_s24 + $0x8] sm:$0xff]  ;;  %v795_v44 = vld [vmem:[%s2120_s24 + $0x10] sm:$0xff]  ;;  %s2536_s14 = scalar_lea.vmem %s2502_s4, %s2094_s22 }
  0xfc   : > { %v1710_v43 = vpack.c.bf16 %v794_v40, %v793_v39  ;;  %v796_v45 = vld [vmem:[%s2120_s24 + $0x18] sm:$0xff]  ;;  %s1958_s30 = smov 64   ;;  %v797_v52 = vld [vmem:[%s2120_s24 + $0x20] sm:$0xff]  ;;  %v798_v53 = vld [vmem:[%s2120_s24 + $0x28] sm:$0xff]  ;;  %vm783_vm9 = vcmask 261120   ;;  %vm788_vm10 = vcmask 523264   ;;  %s2537_s20 = scalar_lea.vmem %s2503_s5, %s2094_s22 }
  0xfd   : > { %v1714_v55 = vpack.c.bf16 %v796_v45, %v795_v44  ;;  %v1718_v56 = vpack.c.bf16 %v798_v53, %v797_v52  ;;  %v799_v57 = vld [vmem:[%s2120_s24 + $0x30] sm:$0xff]  ;;  %v800_v58 = vld [vmem:[%s2120_s24 + $0x38] sm:$0xff]  ;;  %v801_v63 = vld [vmem:[%s2120_s24 + $0x40] sm:$0xff]  ;;  %vm812_vm11 = vcmask 785408   ;;  %s2538_s15 = scalar_lea.vmem %s2504_s6, %s2094_s22  ;;  %s2541_s17 = scalar_lea.vmem [#allocation7], %s2089_s21 }
  0xfe   : > { %1711 = vmatprep.subr.bf16.mxu0 %v1710_v43  ;;  %v1722_v61 = vpack.c.bf16 %v800_v58, %v799_v57  ;;  %v802_v0 = vld [vmem:[%s2120_s24 + $0x48] sm:$0xff]  ;;  %v803_v3 = vld [vmem:[%s2120_s24 + $0x50] sm:$0xff]  ;;  %v804_v4 = vld [vmem:[%s2120_s24 + $0x58] sm:$0xff]  ;;  %s2539_s24 = scalar_lea.vmem %s2506_s8, %s2094_s22  ;;  %s2540_s22 = scalar_lea.vmem [#allocation5], %s2089_s21 }
  0xff   : > { %1713 = vmatpush3.bf16.msra.mxu0 %v1710_v43  ;;  %v1726_v2 = vpack.c.bf16 %v802_v0, %v801_v63  ;;  %v1730_v5 = vpack.c.bf16 %v804_v4, %v803_v3  ;;  %v1046_v26 = vld [vmem:[%s2125_s16] sm:$0xff]  ;;  %v1052_v39 = vld [vmem:[%s2125_s16 + $0x30] sm:$0xff]  ;;  %v1053_v40 = vld [vmem:[%s2125_s16 + $0x38] sm:$0xff]  ;;  %p1575_p12 = scmp.ne.s32.totalorder %s2057_s29, 1 }
 0x100   : > { %v2166_v28 = vld [vmem:[#allocation2 + $0x8] sm:$0xff]  ;;  %v2168_v29 = vld [vmem:[#allocation2 + $0x18] sm:$0xff]  ;;  %1715 = vmatprep.subr.bf16.mxu0 %v1714_v55  ;;  %vm1348_vm4 = vcmask (!%p1575_p12), 125952   ;;  %s1963_s27 = smov (!%p1575_p12), 112  }
 0x101   : > { %v2164_v27 = vld [vmem:[#allocation2] sm:$0xff]  ;;  %v712_v30 = vrot.slane %v2168_v29, 7  ;;  %v719_v32 = vrot.slane %v2166_v28, 1  ;;  %v2178_v34 = vld [vmem:[#allocation2 + $0x10] sm:$0xff]  ;;  %v710_v35 = vrot.slane %v2166_v28, 7  ;;  %v721_v38 = vrot.slane %v2168_v29, 1 }
 0x102   : > { %755 = vrot.lane.b32.xlu0 %v2164_v27, %s1957_s26  ;;  %v718_v31 = vrot.slane %v2164_v27, 1  ;;  %v709_v33 = vrot.slane %v2164_v27, 7  ;;  %v720_v36 = vrot.slane %v2178_v34, 1  ;;  %v711_v37 = vrot.slane %v2178_v34, 7 }
 0x103   : > { %1717 = vmatpush3.bf16.msra.mxu0 %v1714_v55 }
 0x104   : > { %v725_v41 = vsel %vm722_vm8, %v718_v31, %v719_v32  ;;  %v717_v42 = vsel %vm713_vm7, %v712_v30, %v709_v33  ;;  %v716_v47 = vsel %vm713_vm7, %v709_v33, %v710_v35  ;;  %v724_v48 = vsel %vm722_vm8, %v719_v32, %v720_v36  ;;  %1719 = vmatprep.subr.bf16.mxu0 %v1718_v56  ;;  %v1049_v33 = vld [vmem:[%s2125_s16 + $0x18] sm:$0xff] }
 0x105   : > { %771 = vrot.lane.b32.xlu1 %v725_v41, %s1958_s30  ;;  %v735_v46 = vsel %vm2113_vm0, %v725_v41, %v717_v42  ;;  %v715_v49 = vsel %vm713_vm7, %v710_v35, %v711_v37  ;;  %v748_v50 = vsel %vm2135_vm2, %v716_v47, %v724_v48  ;;  %v723_v51 = vsel %vm722_vm8, %v720_v36, %v721_v38  ;;  %v1050_v36 = vld [vmem:[%s2125_s16 + $0x20] sm:$0xff] }
 0x106   : > { %757 = vrot.lane.b32.xlu0 %v2166_v28, %s1957_s26  ;;  %v737_v54 = vsel %vm2131_vm1, %v723_v51, %v715_v49  ;;  %v714_v59 = vsel %vm713_vm7, %v711_v37, %v712_v30  ;;  %v726_v60 = vsel %vm722_vm8, %v721_v38, %v718_v31  ;;  %v1047_v30 = vld [vmem:[%s2125_s16 + $0x8] sm:$0xff]  ;;  %v1048_v31 = vld [vmem:[%s2125_s16 + $0x10] sm:$0xff]  ;;  %v1746_v41 = vpack.c.bf16 %v1053_v40, %v1052_v39  ;;  %v1565_v42 = vld [vmem:[%s2536_s14] ss:$0 sm:$0xff] }
 0x107   : > { %v750_v62 = vsel %vm2139_vm3, %v714_v59, %v726_v60  ;;  %1721 = vmatpush3.bf16.msra.mxu0 %v1718_v56  ;;  %v1734_v32 = vpack.c.bf16 %v1047_v30, %v1046_v26  ;;  %v1738_v35 = vpack.c.bf16 %v1049_v33, %v1048_v31  ;;  %v1051_v37 = vld [vmem:[%s2125_s16 + $0x28] sm:$0xff]  ;;  %v947_v31 = vld [vmem:[%s2537_s20] sm:$0x1] }
 0x108   : > { %1723 = vmatprep.subr.bf16.mxu0 %v1722_v61  ;;  %v1742_v38 = vpack.c.bf16 %v1051_v37, %v1050_v36  ;;  %v1054_v36 = vld [vmem:[%s2125_s16 + $0x40] sm:$0xff]  ;;  %v1055_v37 = vld [vmem:[%s2125_s16 + $0x48] sm:$0xff] }
 0x109   : > { %773 = vrot.lane.b32.xlu1 %v748_v50, %s1958_s30  ;;  %1735 = vmatprep.subr.bf16.mxu1 %v1734_v32  ;;  %v1750_v39 = vpack.c.bf16 %v1055_v37, %v1054_v36 }
 0x10a   : > { %759 = vrot.lane.b32.xlu0 %v2178_v34, %s1957_s26  ;;  %1737 = vmatpush3.bf16.msra.mxu1 %v1734_v32  ;;  %v954_v32 = vsub.s32 0, %v2091_v1 }
 0x10b   : > { %1725 = vmatpush3.bf16.msra.mxu0 %v1722_v61  ;;  %1739 = vmatprep.subr.bf16.mxu1 %v1738_v35 }
 0x10c   : > { %1727 = vmatprep.subr.bf16.mxu0 %v1726_v2 }
 0x10d   : > { %761 = vrot.lane.b32.xlu1 %v2168_v29, %s1957_s26 }
 0x10e   : > { %775 = vrot.lane.b32.xlu0 %v723_v51, %s1958_s30  ;;  %1741 = vmatpush3.bf16.msra.mxu1 %v1738_v35 }
 0x10f   : > { %1729 = vmatpush3.bf16.msra.mxu0 %v1726_v2  ;;  %1743 = vmatprep.subr.bf16.mxu1 %v1742_v38 }
 0x110   : > { %1731 = vmatprep.subr.bf16.mxu0 %v1730_v5 }
 0x111   : > { %777 = vrot.lane.b32.xlu1 %v750_v62, %s1958_s30 }
 0x112   : > { %1745 = vmatpush3.bf16.msra.mxu1 %v1742_v38  ;;  %v949_v38 = vld [vmem:[%s2538_s15] sm:$0x1] }
 0x113   : > { %1733 = vmatpush3.bf16.msra.mxu0 %v1730_v5  ;;  %1747 = vmatprep.subr.bf16.mxu1 %v1746_v41 }
 0x116   : > { %1749 = vmatpush3.bf16.msra.mxu1 %v1746_v41 }
 0x117   : > { %1751 = vmatprep.subr.bf16.mxu1 %v1750_v39 }
 0x11a   : > { %1753 = vmatpush3.bf16.msra.mxu1 %v1750_v39  ;;  %v1570_v39 = vld [vmem:[%s2539_s24] ss:$0 sm:$0xff] }
 0x174   : > { %v756_v6 = vpop.permute.xlu0 %755 }
 0x175   : > { %v784_v7 = vsel %vm783_vm9, %v735_v46, %v756_v6 }
 0x177   : > { %v772_v8 = vpop.permute.xlu1 %771 }
 0x178   : > { %v758_v13 = vpop.permute.xlu0 %757  ;;  %v789_v14 = vsel %vm788_vm10, %v784_v7, %v772_v8 }
 0x179   : > { %v785_v15 = vsel %vm783_vm9, %v716_v47, %v758_v13  ;;  %1663 = vmatprep.mubr.msk.f32.mxu0 %vm812_vm11, %v789_v14 }
 0x17b   : > { %v774_v16 = vpop.permute.xlu1 %773 }
 0x17c   : > { %v790_v17 = vsel %vm788_vm10, %v785_v15, %v774_v16  ;;  %v760_v18 = vpop.permute.xlu0 %759 }
 0x17d   : > { %1664 = vmatmul.mubr.msk.f32.vlgmr.msra.gmra.mrb[0].mxu0 %vm812_vm11, %v790_v17  ;;  %v786_v19 = vsel %vm783_vm9, %v737_v54, %v760_v18 }
 0x17f   : > { %v762_v20 = vpop.permute.xlu1 %761 }
 0x180   : > { %v776_v21 = vpop.permute.xlu0 %775  ;;  %v787_v23 = vsel %vm783_vm9, %v714_v59, %v762_v20 }
 0x181   : > { %v791_v22 = vsel %vm788_vm10, %v786_v19, %v776_v21 }
 0x182   : > { %1666 = vmatprep.mubr.msk.f32.mxu0 %vm812_vm11, %v791_v22 }
 0x183   : > { %v778_v24 = vpop.permute.xlu1 %777 }
 0x184   : > { %v792_v25 = vsel %vm788_vm10, %v787_v23, %v778_v24 }
 0x185   : > { %1667 = vmatmul.mubr.msk.f32.gmra.mrb[2].mxu0 %vm812_vm11, %v792_v25 }
 0x250   : > { %v1665_v43 = vpop.f32.mrb[0].mxu0 }
 0x251   : > { %v897_v44 = vadd.f32 %v1665_v43, %v1565_v42  ;;  %v891_v45 = vpop.f32.mrb[1].mxu0 }
 0x252   : > { %v892_v46 = vadd.f32 %v1565_v42, %v891_v45 }
 0x253   : > { %v911_v47 = vsel %vm783_vm9, %v897_v44, 0.0  ;;  %v925_v48 = vmul.f32 %v897_v44, %v897_v44 }
 0x254   : > { %v910_v49 = vsel %vm783_vm9, %v892_v46, 0.0  ;;  %v924_v50 = vmul.f32 %v892_v46, %v892_v46 }
 0x255   : > { %v929_v51 = vsel %vm783_vm9, %v925_v48, 0.0  ;;  %v912_v52 = vadd.f32 %v911_v47, %v910_v49  ;;  %v1056_v48 = vld [vmem:[%s2125_s16 + $0x50] sm:$0xff]  ;;  %v1057_v49 = vld [vmem:[%s2125_s16 + $0x58] sm:$0xff] }
 0x256   : > { %v928_v53 = vsel %vm783_vm9, %v924_v50, 0.0 }
 0x257   : > { %v930_v54 = vadd.f32 %v929_v51, %v928_v53  ;;  %v1754_v51 = vpack.c.bf16 %v1057_v49, %v1056_v48 }
 0x258   : > { %v1668_v55 = vpop.f32.mrb[2].mxu0 }
 0x259   : > { %v907_v56 = vadd.f32 %v1668_v55, %v1565_v42  ;;  %v901_v57 = vpop.f32.mrb[3].mxu0  ;;  %1755 = vmatprep.subr.bf16.mxu1 %v1754_v51 }
 0x25a   : > { %v902_v58 = vadd.f32 %v1565_v42, %v901_v57  ;;  %1757 = vmatpush3.bf16.msra.mxu1 %v1754_v51 }
 0x25b   : > { %v927_v59 = vmul.f32 %v907_v56, %v907_v56  ;;  %v915_v63 = vsel %vm783_vm9, %v907_v56, 0.0 }
 0x25c   : > { %v913_v60 = vsel %vm783_vm9, %v902_v58, 0.0  ;;  %v926_v61 = vmul.f32 %v902_v58, %v902_v58 }
 0x25d   : > { %v914_v62 = vadd.f32 %v913_v60, %v912_v52  ;;  %v933_v4 = vsel %vm783_vm9, %v927_v59, 0.0 }
 0x25e   : > { %v931_v0 = vsel %vm783_vm9, %v926_v61, 0.0 }
 0x25f   : > { %v916_v2 = vadd.f32 %v915_v63, %v914_v62  ;;  %v932_v3 = vadd.f32 %v931_v0, %v930_v54 }
 0x261   : > { %v917_v5 = vrot.slane %v916_v2, 4  ;;  %v934_v6 = vadd.f32 %v933_v4, %v932_v3 }
 0x263   : > { %v918_v7 = vadd.f32 %v917_v5, %v916_v2  ;;  %v935_v8 = vrot.slane %v934_v6, 4 }
 0x265   : > { %v919_v13 = vrot.slane %v918_v7, 2  ;;  %v936_v14 = vadd.f32 %v935_v8, %v934_v6 }
 0x267   : > { %v920_v15 = vadd.f32 %v919_v13, %v918_v7  ;;  %v937_v16 = vrot.slane %v936_v14, 2 }
 0x269   : > { %v921_v17 = vrot.slane %v920_v15, 1  ;;  %v938_v18 = vadd.f32 %v937_v16, %v936_v14 }
 0x26b   : > { %v922_v19 = vadd.f32 %v921_v17, %v920_v15  ;;  %v939_v20 = vrot.slane %v938_v18, 1 }
 0x26d   : > { %v923_v21 = vmul.f32 0.03125, %v922_v19  ;;  %v940_v22 = vadd.f32 %v939_v20, %v938_v18 }
 0x26f   : > { %v941_v23 = vmul.f32 0.03125, %v940_v22  ;;  %v942_v24 = vmul.f32 %v923_v21, %v923_v21 }
 0x271   : > { %v943_v25 = vsub.f32 %v941_v23, %v942_v24 }
 0x273   : > { %v944_v26 = vmax.f32 %v943_v25, 0.0 }
 0x275   : > { %v945_v30 = vadd.f32 1e-05, %v944_v26 }
 0x277   : > { %1828 = vrsqrt.f32 %v945_v30 }
 0x281   : > { %v1829_v33 = vpop.eup %1828 }
 0x282   : > { %v948_v35 = vmul.f32 %v1829_v33, %v947_v31 }
 0x284   : > { %v950_v40 = vmul.f32 %v948_v35, %v923_v21  ;;  %v955_v41 = vrot.slane %v948_v35, %v954_v32 }
 0x286   : > { %v958_v42 = vmul.f32 %v955_v41, %v902_v58  ;;  %v951_v43 = vsub.f32 %v949_v38, %v950_v40  ;;  %v957_v45 = vmul.f32 %v955_v41, %v897_v44  ;;  %v956_v47 = vmul.f32 %v955_v41, %v892_v46 }
 0x287   : > { %v959_v50 = vmul.f32 %v955_v41, %v907_v56 }
 0x288   : > { %v964_v52 = vrot.slane %v951_v43, %v954_v32 }
 0x28a   : > { %v967_v53 = vadd.f32 %v964_v52, %v957_v45  ;;  %v966_v54 = vadd.f32 %v964_v52, %v956_v47  ;;  %v969_v55 = vadd.f32 %v964_v52, %v959_v50  ;;  %v968_v57 = vadd.f32 %v964_v52, %v958_v42 }
 0x28c   : > { %vm971_vm12 = vcmp.gt.f32.partialorder %v967_v53, 0.0  ;;  %v975_v59 = vmul.f32 0.01, %v967_v53  ;;  %vm970_vm13 = vcmp.gt.f32.partialorder %v966_v54, 0.0  ;;  %v974_v60 = vmul.f32 0.01, %v966_v54 }
 0x28d   : > { %vm973_vm14 = vcmp.gt.f32.partialorder %v969_v55, 0.0  ;;  %v977_v58 = vmul.f32 0.01, %v969_v55  ;;  %vm972_vm15 = vcmp.gt.f32.partialorder %v968_v57, 0.0  ;;  %v976_v44 = vmul.f32 0.01, %v968_v57 }
 0x28e   : > { %v979_v46 = vsel %vm971_vm12, %v967_v53, %v975_v59  ;;  %v978_v61 = vsel %vm970_vm13, %v966_v54, %v974_v60 }
 0x28f   : > { %1012 = vrot.lane.b32.xlu1 %v979_v46, %s1957_s26  ;;  %v983_v56 = vrot.slane %v979_v46, 7  ;;  %v991_v62 = vrot.slane %v979_v46, 1  ;;  %1010 = vrot.lane.b32.xlu0 %v978_v61, %s1957_s26  ;;  %v982_v63 = vrot.slane %v978_v61, 7  ;;  %v990_v0 = vrot.slane %v978_v61, 1 }
 0x290   : > { %v981_v2 = vsel %vm973_vm14, %v969_v55, %v977_v58  ;;  %v980_v3 = vsel %vm972_vm15, %v968_v57, %v976_v44 }
 0x291   : > { %v985_v4 = vrot.slane %v981_v2, 7  ;;  %v993_v5 = vrot.slane %v981_v2, 1  ;;  %v984_v6 = vrot.slane %v980_v3, 7  ;;  %v992_v7 = vrot.slane %v980_v3, 1 }
 0x292   : > { %v996_v8 = vsel %vm722_vm8, %v990_v0, %v991_v62  ;;  %v988_v13 = vsel %vm713_vm7, %v982_v63, %v983_v56 }
 0x293   : > { %1016 = vrot.lane.b32.xlu1 %v981_v2, %s1957_s26  ;;  %1014 = vrot.lane.b32.xlu0 %v980_v3, %s1957_s26  ;;  %v989_v14 = vsel %vm713_vm7, %v985_v4, %v982_v63  ;;  %v995_v15 = vsel %vm722_vm8, %v991_v62, %v992_v7  ;;  %v987_v16 = vsel %vm713_vm7, %v983_v56, %v984_v6 }
 0x294   : > { %v998_v17 = vsel %vm2113_vm0, %v996_v8, %v989_v14  ;;  %v994_v18 = vsel %vm722_vm8, %v992_v7, %v993_v5  ;;  %v986_v19 = vsel %vm713_vm7, %v984_v6, %v985_v4  ;;  %v997_v21 = vsel %vm722_vm8, %v993_v5, %v990_v0 }
 0x295   : > { %v1000_v20 = vsel %vm2131_vm1, %v994_v18, %v987_v16  ;;  %v1003_v22 = vsel %vm2135_vm2, %v988_v13, %v995_v15  ;;  %v1005_v9 = vsel %vm2139_vm3, %v986_v19, %v997_v21  ;;  %vm1226_vm0 = vcmask 1041409   ;;  %vm1760_vm2 = vmpackc.low (!%p1575_p12), %vm783_vm9, %vm783_vm9 }
 0x296   : > { %vm1229_vm1 = vcmask 254976   ;;  %vm1960_vm3 = vmmov (!%p1575_p12), 0  }
 0x297   : > { %1026 = vrot.lane.b32.xlu0 %v996_v8, %s1958_s30  ;;  %1028 = vrot.lane.b32.xlu1 %v1003_v22, %s1958_s30 }
 0x29b   : > { %1030 = vrot.lane.b32.xlu0 %v994_v18, %s1958_s30  ;;  %1032 = vrot.lane.b32.xlu1 %v1005_v9, %s1958_s30 }
 0x301   : > { %v1013_v23 = vpop.permute.xlu1 %1012  ;;  %v1011_v10 = vpop.permute.xlu0 %1010 }
 0x302   : > { %v1039_v1 = vsel %vm783_vm9, %v988_v13, %v1013_v23  ;;  %v1038_v11 = vsel %vm783_vm9, %v998_v17, %v1011_v10 }
 0x305   : > { %v1017_v24 = vpop.permute.xlu1 %1016  ;;  %v1015_v25 = vpop.permute.xlu0 %1014 }
 0x306   : > { %v1041_v32 = vsel %vm783_vm9, %v986_v19, %v1017_v24  ;;  %v1040_v33 = vsel %vm783_vm9, %v1000_v20, %v1015_v25 }
 0x309   : > { %v1027_v26 = vpop.permute.xlu0 %1026  ;;  %v1029_v30 = vpop.permute.xlu1 %1028 }
 0x30a   : > { %v1043_v31 = vsel %vm788_vm10, %v1039_v1, %v1029_v30  ;;  %v1042_v12 = vsel %vm788_vm10, %v1038_v11, %v1027_v26 }
 0x30b   : > { %1693 = vmatprep.mubr.msk.f32.mxu1 %vm812_vm11, %v1042_v12 }
 0x30c   : > { %1694 = vmatmul.mubr.msk.f32.vlgmr.msra.gmra.mrb[0].mxu1 %vm812_vm11, %v1043_v31 }
 0x30d   : > { %v1031_v35 = vpop.permute.xlu0 %1030  ;;  %v1033_v36 = vpop.permute.xlu1 %1032 }
 0x30e   : > { %v1044_v37 = vsel %vm788_vm10, %v1040_v33, %v1031_v35  ;;  %v1045_v38 = vsel %vm788_vm10, %v1041_v32, %v1033_v36 }
 0x30f   : > { %1696 = vmatprep.mubr.msk.f32.mxu1 %vm812_vm11, %v1044_v37 }
 0x310   : > { %1697 = vmatmul.mubr.msk.f32.gmra.mrb[2].mxu1 %vm812_vm11, %v1045_v38 }
 0x3df   : > { %v1695_v40 = vpop.f32.mrb[0].mxu1 }
 0x3e0   : > { %v1149_v41 = vadd.f32 %v1695_v40, %v1570_v39  ;;  %v1143_v42 = vpop.f32.mrb[1].mxu1 }
 0x3e1   : > { %v1144_v43 = vadd.f32 %v1570_v39, %v1143_v42 }
 0x3e2   : > { %v2328_v45 = vadd.f32 %v1149_v41, %v2166_v28 }
 0x3e3   : > { %v2331_v47 = vadd.f32 %v1144_v43, %v2164_v27  ;;  %v1698_v48 = vpop.f32.mrb[2].mxu1 }
 0x3e4   : > { %v1167_v49 = vsel %vm783_vm9, %v2328_v45, 0.0  ;;  %v1187_v50 = vmul.f32 %v2328_v45, %v2328_v45  ;;  %v1159_v51 = vadd.f32 %v1698_v48, %v1570_v39  ;;  %v1153_v52 = vpop.f32.mrb[3].mxu1 }
 0x3e5   : > { %v1166_v53 = vsel %vm783_vm9, %v2331_v47, 0.0  ;;  %v1186_v54 = vmul.f32 %v2331_v47, %v2331_v47  ;;  %v1154_v55 = vadd.f32 %v1570_v39, %v1153_v52 }
 0x3e6   : > { %v1191_v57 = vsel %vm783_vm9, %v1187_v50, 0.0  ;;  %v1168_v59 = vadd.f32 %v1167_v49, %v1166_v53  ;;  %v2343_v60 = vadd.f32 %v1159_v51, %v2168_v29 }
 0x3e7   : > { %v1190_v58 = vsel %vm783_vm9, %v1186_v54, 0.0  ;;  %v2347_v44 = vadd.f32 %v1154_v55, %v2178_v34 }
 0x3e8   : > { %v1169_v46 = vrot.slane %v1168_v59, 4  ;;  %v1192_v61 = vadd.f32 %v1191_v57, %v1190_v58  ;;  %v1176_v56 = vsel %vm783_vm9, %v2343_v60, 0.0  ;;  %v1189_v62 = vmul.f32 %v2343_v60, %v2343_v60 }
 0x3e9   : > { %v1175_v63 = vsel %vm783_vm9, %v2347_v44, 0.0  ;;  %v1188_v0 = vmul.f32 %v2347_v44, %v2347_v44 }
 0x3ea   : > { %v1170_v2 = vadd.f32 %v1169_v46, %v1168_v59  ;;  %v1193_v3 = vrot.slane %v1192_v61, 4  ;;  %v1200_v4 = vsel %vm783_vm9, %v1189_v62, 0.0  ;;  %v1177_v5 = vadd.f32 %v1176_v56, %v1175_v63 }
 0x3eb   : > { %v1199_v6 = vsel %vm783_vm9, %v1188_v0, 0.0  ;;  %v1962_v0 = vmov (!%p1575_p12), 0  }
 0x3ec   : > { %v1171_v7 = vrot.slane %v1170_v2, 2  ;;  %v1194_v8 = vadd.f32 %v1193_v3, %v1192_v61  ;;  %v1178_v13 = vrot.slane %v1177_v5, 4  ;;  %v1201_v14 = vadd.f32 %v1200_v4, %v1199_v6  ;;  %1834 = vset.pattern.permute.xlu0 (!%p1575_p12), %v1962_v0  ;;  %v1256_v3 = vld [vmem:[%s2507_s9] sm:$0xf] (!%p1575_p12) }
 0x3ee   : > { %v1172_v15 = vadd.f32 %v1171_v7, %v1170_v2  ;;  %v1195_v16 = vrot.slane %v1194_v8, 2  ;;  %v1179_v17 = vadd.f32 %v1178_v13, %v1177_v5  ;;  %v1202_v18 = vrot.slane %v1201_v14, 4 }
 0x3f0   : > { %v1173_v19 = vrot.slane %v1172_v15, 1  ;;  %v1196_v20 = vadd.f32 %v1195_v16, %v1194_v8  ;;  %v1180_v21 = vrot.slane %v1179_v17, 2  ;;  %v1203_v22 = vadd.f32 %v1202_v18, %v1201_v14 }
 0x3f2   : > { %v1174_v9 = vadd.f32 %v1173_v19, %v1172_v15  ;;  %v1197_v23 = vrot.slane %v1196_v20, 1  ;;  %v1181_v10 = vadd.f32 %v1180_v21, %v1179_v17  ;;  %v1204_v24 = vrot.slane %v1203_v22, 2 }
 0x3f4   : > { %v1184_v25 = vmul.f32 0.0625, %v1174_v9  ;;  %v1198_v1 = vadd.f32 %v1197_v23, %v1196_v20  ;;  %v1182_v11 = vrot.slane %v1181_v10, 1  ;;  %v1205_v26 = vadd.f32 %v1204_v24, %v1203_v22 }
 0x3f6   : > { %v1208_v30 = vmul.f32 0.0625, %v1198_v1  ;;  %v1210_v31 = vmul.f32 %v1184_v25, %v1184_v25  ;;  %v1236_v12 = vsub.f32 %v2331_v47, %v1184_v25  ;;  %v1237_v32 = vsub.f32 %v2328_v45, %v1184_v25 }
 0x3f7   : > { %v1183_v33 = vadd.f32 %v1182_v11, %v1181_v10  ;;  %v1206_v35 = vrot.slane %v1205_v26, 1 }
 0x3f8   : > { %v1212_v36 = vsub.f32 %v1208_v30, %v1210_v31 }
 0x3f9   : > { %v1185_v37 = vmul.f32 0.0625, %v1183_v33  ;;  %v1207_v38 = vadd.f32 %v1206_v35, %v1205_v26 }
 0x3fa   : > { %v1214_v39 = vmax.f32 %v1212_v36, 0.0 }
 0x3fb   : > { %v1209_v40 = vmul.f32 0.0625, %v1207_v38  ;;  %v1211_v41 = vmul.f32 %v1185_v37, %v1185_v37  ;;  %v1227_v42 = vsel %vm1226_vm0, %v1185_v37, %v1184_v25  ;;  %v1238_v43 = vsub.f32 %v2347_v44, %v1185_v37 }
 0x3fc   : > { %v1216_v48 = vmul.f32 1.0666667, %v1214_v39  ;;  %1230 = vst.msk [vmem:[%s2540_s22] sm:$0x3] %vm1229_vm1, %v1227_v42  ;;  %v1239_v45 = vsub.f32 %v2343_v60, %v1185_v37 }
 0x3fd   : > { %v1213_v47 = vsub.f32 %v1209_v40, %v1211_v41 }
 0x3fe   : > { %v1218_v49 = vadd.f32 1e-05, %v1216_v48 }
 0x3ff   : > { %v1215_v50 = vmax.f32 %v1213_v47, 0.0 }
 0x400   : > { %1830 = vrsqrt.f32 %v1218_v49 }
 0x401   : > { %v1217_v51 = vmul.f32 1.0666667, %v1215_v50 }
 0x403   : > { %v1219_v52 = vadd.f32 1e-05, %v1217_v51 }
 0x405   : > { %1832 = vrsqrt.f32 %v1219_v52 }
 0x40a   : > { %v1831_v53 = vpop.eup %1830 }
 0x40b   : > { %v1240_v54 = vmul.f32 %v1831_v53, %v1236_v12  ;;  %v1241_v55 = vmul.f32 %v1831_v53, %v1237_v32  ;;  %v1222_v60 = vmul.f32 %v1831_v53, %v1218_v49 }
 0x40d   : > { %v1244_v57 = vadd.f32 %v1240_v54, %v2164_v27  ;;  %v1245_v59 = vadd.f32 %v1241_v55, %v2166_v28  ;;  %v1959_v28 = vmov (!%p1575_p12), 0.0|0.0  }
 0x40e   : > { %1255 = sbr.rel (%p1575_p12) target bundleno = 1386 (0x56a), region = 72  ;;  %1758 = vmatprep.subr.bf16.mxu0 (!%p1575_p12), %v1959_v28 }
 0x40f   : > { %v1833_v58 = vpop.eup %1832  ;;  %1248 = vst.msk [vmem:[#allocation2] sm:$0xff] %vm783_vm9, %v1244_v57  ;;  %1249 = vst.msk [vmem:[#allocation2 + $0x8] sm:$0xff] %vm783_vm9, %v1245_v59  ;;  %v1759_v27 = vpack.c.bf16 (!%p1575_p12), %v1245_v59, %v1244_v57 }
 0x410   : > { %v1223_v44 = vmul.f32 %v1833_v58, %v1219_v52  ;;  %v1242_v46 = vmul.f32 %v1833_v58, %v1238_v43  ;;  %v1243_v61 = vmul.f32 %v1833_v58, %v1239_v45 }
 0x411   : > { %1761 = vmatpush3.bf16.xpose.msk.msra.mxu0 (!%p1575_p12), %vm1760_vm2, %v1759_v27 }
 0x412   : > { %v1233_v56 = vsel %vm1226_vm0, %v1223_v44, %v1222_v60  ;;  %v1246_v62 = vadd.f32 %v1242_v46, %v2178_v34  ;;  %v1247_v63 = vadd.f32 %v1243_v61, %v2168_v29  ;;  %v1257_v29 = vld [vmem:[%s2508_s10] sm:$0xf] (!%p1575_p12)  ;;  %v1961_v34 = vmov (!%p1575_p12), 0.0   ;;  %1762 = vmatprep.subr.bf16.mxu0 (!%p1575_p12), %v1959_v28 }
 0x413   : > { %1235 = vst.msk [vmem:[%s2541_s17] sm:$0x3] %vm1229_vm1, %v1233_v56  ;;  %1707 = vmatprep.mubr.msk.f32.mxu0 (!%p1575_p12), %vm1960_vm3, %v1961_v34  ;;  %1260 = vperm.xlu0 (!%p1575_p12), %1834, %v1257_v29  }
 0x414   : > { %1250 = vst.msk [vmem:[#allocation2 + $0x10] sm:$0xff] %vm783_vm9, %v1246_v62  ;;  %1251 = vst.msk [vmem:[#allocation2 + $0x18] sm:$0xff] %vm783_vm9, %v1247_v63  ;;  %v1763_v2 = vpack.c.bf16 (!%p1575_p12), %v1247_v63, %v1246_v62 }
 0x419   : > { %1765 = vmatpush3.bf16.xpose.msk.msra.mxu0 %vm1760_vm2, %v1763_v2 }
 0x420   : > { %1708 = vmatmul.mubr.msk.f32.vlgmr.msra.gmra.mrb[0].mxu0 %vm783_vm9, %v1256_v3 }
 0x492   : > { %v1261_v4 = vpop.permute.xlu0 %1260 }
 0x4f3   : > { %v1344_v5 = vpop.f32.mrb[0].mxu0 }
 0x4f4   : > { %v1345_v6 = vadd.f32 %v1344_v5, %v1261_v4  ;;  %v1709_v7 = vpop.f32.mrb[1].mxu0 }
 0x4f6   : > { %1351 = vrot.lane.b32.xlu0 %v1345_v6, %s1963_s27  ;;  %1349 = vst.msk [vmem:[#allocation3] sm:$0xf] %vm1348_vm4, %v1345_v6 }
 0x568   : > { %v1352_v8 = vpop.permute.xlu0 %1351 }
 0x569   : > { %1355 = vst.msk [vmem:[#allocation3 + $0x4] sm:$0xf] %vm1348_vm4, %v1352_v8 }
 0x56a PF: > { %s1356_s23 = sand.u32 1, %s2057_s29   ;;  %s2518_s15 = sshll.u32 %s2057_s29, 5 }
 0x56b   : > { %s2396_s24 = scalar_lea.hbm %s2510_s12, %s2518_s15  ;;  %s2542_s22 = scalar_lea.vmem [#allocation5], %s2089_s21 }
 0x56c   : > { %s1388_s17 = sshll.u32 %s2542_s22, 4  ;;  %s1964_s14 = smov [#allocation3]   ;;  %s2400_s17 = int_to_ptr.vmem [resolvable:$true] %s1388_s17 }
 0x56d   : > { %s2402_s19 = sshll.u32 %s1964_s14, 4  ;;  %s2404_s25 = scalar_lea.sflag [#allocation6], %s1356_s23  ;;  %s1373_s19 = int_to_ptr.vmem [resolvable:$true] %s2402_s19 }
 0x56e   : > { %s1835_s20 = scalar_lea.vmem %s2400_s17, 32  ;;  %s1965_s27 = smov [#allocation5]  }
 0x56f   : > { %p1836_p13 = scmp.ne.s32.totalorder %s2400_s17, %s1835_s20  ;;  %s1839_s16 = sshll.u32 %s1965_s27, 4  ;;  %s1840_s16 = int_to_ptr.vmem [resolvable:$false] %s1839_s16 }
 0x570   : > { %s1841_s26 = scalar_lea.vmem %s1840_s16, 64  ;;  %p1842_p3 = scmp.lt.s32.totalorder %s2400_s17, %s1840_s16 }
 0x571   : > { %p1837_p0 = pnand %p1836_p13, %p2077_p5  ;;  %p1843_p4 = scmp.lt.s32.totalorder %s1841_s26, %s1835_s20 }
 0x573   : > { %p1838_p1 = pneg %p1837_p0  ;;  %p1844_p7 = por %p1843_p4, %p1842_p3 }
 0x575   : > { %p1845_p8 = pnand %p1844_p7, %p1838_p1 }
 0x577   : > { %1848 = shalt.err (!%p1845_p8)
}
 0x578   : > { %s1849_s23 = scalar_lea.hbm %s2396_s24, 32  ;;  %s1853_s27 = scalar_lea.hbm %s2510_s12, 64 }
 0x579   : > { %p1850_p9 = scmp.ne.s32.totalorder %s2396_s24, %s1849_s23  ;;  %p1854_p12 = scmp.lt.u32.totalorder %s2396_s24, %s2510_s12 }
 0x57a   : > { %p1855_p13 = scmp.lt.u32.totalorder %s1853_s27, %s1849_s23  ;;  %p1857_p1 = scmp.lt.u32.totalorder %s1849_s23, %s2396_s24 }
 0x57b   : > { %p1851_p10 = pnand %p1850_p9, %p2077_p5 }
 0x57c   : > { %p1856_p0 = por %p1855_p13, %p1854_p12 }
 0x57d   : > { %p1852_p11 = pneg %p1851_p10 }
 0x57e   : > { %p1858_p3 = por %p1857_p1, %p1856_p0 }
 0x580   : > { %p1859_p4 = pnand %p1858_p3, %p1852_p11 }
 0x582   : > { %1862 = shalt.err (!%p1859_p4)
}
 0x583   : > { %1771 = dma.vmem_to_hbm [thread:$0]  (%p2077_p5), %s2400_s17, 32, %s2396_s24, %s2404_s25  }
 0x584   : > { %s1863_s20 = scalar_lea.vmem %s1373_s19, 128  ;;  %p1870_p10 = scmp.lt.s32.totalorder %s1373_s19, %s1373_s19 }
 0x585   : > { %p1864_p7 = scmp.ne.s32.totalorder %s1373_s19, %s1863_s20  ;;  %p1871_p12 = scmp.lt.s32.totalorder %s1863_s20, %s1863_s20 }
 0x587   : > { %p1865_p8 = pnand %p1864_p7, %p328_p2  ;;  %p1872_p13 = por %p1871_p12, %p1870_p10 }
 0x589   : > { %p1866_p9 = pneg %p1865_p8 }
 0x58b   : > { %p1873_p0 = pnand %p1872_p13, %p1866_p9 }
 0x58d   : > { %1876 = shalt.err (!%p1873_p0)
}
 0x58e   : > { %s1877_s23 = scalar_lea.hbm %s2509_s11, 128 }
 0x58f   : > { %p1878_p11 = scmp.ne.s32.totalorder %s2509_s11, %s1877_s23  ;;  %p1883_p4 = scmp.lt.u32.totalorder %s1877_s23, %s2509_s11 }
 0x591   : > { %p1879_p1 = pnand %p1878_p11, %p328_p2 }
 0x593   : > { %p1880_p3 = pneg %p1879_p1 }
 0x595   : > { %p1885_p7 = pnand %p1883_p4, %p1880_p3 }
 0x597   : > { %1888 = shalt.err (!%p1885_p7)
}
 0x598   : > { %s1966_s27 = smov 4   ;;  %s2543_s15 = sshll.u32 %s2057_s29, 5 }
 0x599   : > { %1770 = dma.vmem_to_hbm [thread:$0]  (%p328_p2), %s1373_s19, 128, %s2509_s11, [#allocation4], %s1958_s30, %s1958_s30, %s1966_s27  }
 0x59a   : > { %s2454_s14 = scalar_lea.hbm %s2511_s13, %s2543_s15  ;;  %s2544_s23 = scalar_lea.vmem [#allocation7], %s2089_s21 }
 0x59b   : > { %s1401_s24 = sshll.u32 %s2544_s23, 4  ;;  %s1967_s0 = smov [#allocation7]   ;;  %s1402_s24 = int_to_ptr.vmem [resolvable:$true] %s1401_s24 }
 0x59c   : > { %s1889_s17 = scalar_lea.vmem %s1402_s24, 32  ;;  %s1893_s16 = sshll.u32 %s1967_s0, 4  ;;  %s1894_s16 = int_to_ptr.vmem [resolvable:$false] %s1893_s16 }
 0x59d   : > { %p1890_p8 = scmp.ne.s32.totalorder %s1402_s24, %s1889_s17  ;;  %s1895_s20 = scalar_lea.vmem %s1894_s16, 64 }
 0x59e   : > { %p1896_p12 = scmp.lt.s32.totalorder %s1402_s24, %s1894_s16  ;;  %p1897_p13 = scmp.lt.s32.totalorder %s1895_s20, %s1889_s17 }
 0x59f   : > { %p1891_p9 = pnand %p1890_p8, %p2077_p5 }
 0x5a0   : > { %p1898_p0 = por %p1897_p13, %p1896_p12 }
 0x5a1   : > { %p1892_p10 = pneg %p1891_p9 }
 0x5a3   : > { %p1899_p11 = pnand %p1898_p0, %p1892_p10 }
 0x5a5   : > { %1902 = shalt.err (!%p1899_p11)
}
 0x5a6   : > { %s1903_s21 = scalar_lea.hbm %s2454_s14, 32  ;;  %s1907_s0 = scalar_lea.hbm %s2511_s13, 64 }
 0x5a7   : > { %p1904_p1 = scmp.ne.s32.totalorder %s2454_s14, %s1903_s21  ;;  %p1908_p7 = scmp.lt.u32.totalorder %s2454_s14, %s2511_s13 }
 0x5a8   : > { %p1909_p8 = scmp.lt.u32.totalorder %s1907_s0, %s1903_s21  ;;  %p1911_p10 = scmp.lt.u32.totalorder %s1903_s21, %s2454_s14 }
 0x5a9   : > { %p1905_p3 = pnand %p1904_p1, %p2077_p5 }
 0x5aa   : > { %p1910_p9 = por %p1909_p8, %p1908_p7 }
 0x5ab   : > { %p1906_p4 = pneg %p1905_p3 }
 0x5ac   : > { %p1912_p12 = por %p1911_p10, %p1910_p9 }
 0x5ae   : > { %p1913_p13 = pnand %p1912_p12, %p1906_p4 }
 0x5b0   : > { %1916 = shalt.err (!%p1913_p13)
}
 0x5b1   : > { %1772 = dma.vmem_to_hbm [thread:$0]  (%p2077_p5), %s1402_s24, 32, %s2454_s14, %s2404_s25  }
 0x5b2   : > { %1934 = dma.done.wait (%p328_p2), [#allocation4], 128  }
 0x5b3   : > { %1936 = vsyncadd (%p328_p2), [#allocation4], 4294967168 }
 0x5b4 PF: > { %p1786_p0 = scmp.ge.s32.totalorder %s1955_s28, 2  ;;  %s2546_s22 = sadd.s32 4294967294, %s1955_s28  }
 0x5b5   : > { %s1417_s23 = sand.u32 1, %s2546_s22  }
 0x5b6   : > { %p1778_p11 = pnand %p1786_p0, %p2081_p6  ;;  %s1418_s17 = scalar_lea.sflag [#allocation6], %s1417_s23 }
 0x5b8   : > { %1938 = dma.done.wait (!%p1778_p11), %s1418_s17, 64  }
 0x5b9   : > { %1940 = vsyncadd (!%p1778_p11), %s1418_s17, 4294967232  ;;  %s2547_s28 = sld [smem:[#allocation12_spill]]  ;;  %s2548_s25 = sld [smem:[#allocation10_spill]] }
 0x5ba   : > { %s2549_s26 = sld [smem:[#allocation11_spill]]  ;;  %s2550_s27 = sld [smem:[#allocation13_spill]] }
 0x5bf   : > { %p25_p5 = scmp.ge.s32.totalorder %s2547_s28, 4  }
 0x5c1   :  { %27 = sbr.rel (!%p25_p5) target bundleno = 6 (0x6), region = 147 }
 0x5c8   :  { %1432 = vsyncpa [#allocation4], 1 }
 0x5c9   :  { %1434 = vsyncpa [#allocation4 + $0x1], 1 }
 0x5ca   :  { %1435 = vsyncpa [#allocation6], 1 }
 0x5cb   :  { %1437 = vsyncpa [#allocation6 + $0x1], 1 }

</bundles_post_ra>
